<compile_context>
chip_gen: v7x
topology: tpu7x:2x2x1
jax: 0.10.0
libtpu: 0.0.40
codegen_flags: <defaults>
</compile_context>

<pallas_src>
import functools

import jax
import jax.numpy as jnp
from jax import lax
from jax.experimental import pallas as pl
from jax.experimental.pallas import tpu as pltpu

_LANE = 128
# x[., H] (contract axis 1)  ·  W[out, H] (contract axis 1)  ->  [., out]
_CONTRACT_LAST = (((1,), (1,)), ((), ()))


def _head_kernel(x_ref, w1_ref, b1_ref, w2_ref, b2_ref, o_ref):
    # x: [TB, H]   w1: [H, H] (torch [out, in])   b1: [1, H]
    # w2: [Lp, H] (torch [out, in], label-padded) b2: [1, Lp]   o: [TB, Lp]
    x = x_ref[...]

    # dense: Linear(H, H).  Contract on the last axis of both operands so the
    # MXU consumes the torch-layout weight directly (no transpose, no upcast).
    h = lax.dot_general(x, w1_ref[...], _CONTRACT_LAST,
                        preferred_element_type=jnp.float32)
    h = h + b1_ref[...].astype(jnp.float32)
    h = jnp.tanh(h)                      # EUP slot; dropout is identity in eval

    # out_proj: Linear(H, num_labels).  Cast the activation back to the weight
    # dtype so the second matmul stays on the fast (bf16-capable) MXU path.
    h = h.astype(w2_ref.dtype)
    o = lax.dot_general(h, w2_ref[...], _CONTRACT_LAST,
                        preferred_element_type=jnp.float32)
    o = o + b2_ref[...].astype(jnp.float32)

    o_ref[...] = o.astype(o_ref.dtype)


def prepare_head_params(w_dense, b_dense, w_out, b_out):
    """One-time parameter prep (do at load time, NOT per forward call).

    Keeps torch [out, in] weight layout (the kernel contracts on the last axis,
    so no transpose is ever materialized) and zero-pads num_labels up to a
    lane-dense multiple of 128 so the output writeback is unmasked.
    """
    H = w_dense.shape[0]
    L = int(w_out.shape[0])
    Lp = max(_LANE, ((L + _LANE - 1) // _LANE) * _LANE)
    w2p = jnp.zeros((Lp, w_out.shape[1]), dtype=w_out.dtype).at[:L].set(w_out)
    b2p = jnp.zeros((Lp,), dtype=b_out.dtype).at[:L].set(b_out)
    return w_dense, b_dense.reshape(1, H), w2p, b2p.reshape(1, Lp), L


@functools.partial(jax.jit, static_argnames=("num_labels", "block_b"))
def wav2vec2_classification_head(features, w1, b1, w2p, b2p, *,
                                 num_labels, block_b=512):
    """features: [B, H];  w1: [H, H], w2p: [Lp, H] in torch [out, in] layout."""
    B, H = features.shape
    Lp = w2p.shape[0]

    # Batch tile: whole array when small, otherwise a multiple-of-8 tile.
    tb = B if B <= block_b else block_b
    if tb != B and tb % 8 != 0:
        tb = max(8, (tb // 8) * 8)
    grid = (pl.cdiv(B, tb),)

    act_bytes = jnp.dtype(features.dtype).itemsize
    w_bytes = jnp.dtype(w1.dtype).itemsize
    est = (2 * tb * H * act_bytes            # double-buffered x tiles
           + 2 * tb * Lp * act_bytes         # double-buffered out tiles
           + (H * H + Lp * H + H + Lp) * w_bytes   # resident weights + biases
           + tb * H * 4)                     # f32 intermediate
    vmem_limit = int(min(64 * 1024 * 1024, max(16 * 1024 * 1024, 2 * est)))

    cost = pl.CostEstimate(
        flops=2 * B * H * (H + Lp),
        transcendentals=B * H,
        bytes_accessed=(B * H + B * Lp) * act_bytes
                       + (H * H + Lp * H + H + Lp) * w_bytes,
    )

    out = pl.pallas_call(
        _head_kernel,
        out_shape=jax.ShapeDtypeStruct((B, Lp), features.dtype),
        grid_spec=pltpu.PrefetchScalarGridSpec(
            num_scalar_prefetch=0,
            grid=grid,
            in_specs=[
                pl.BlockSpec((tb, H), lambda i: (i, 0)),   # activations: batch-tiled
                pl.BlockSpec((H, H), lambda i: (0, 0)),    # dense W: resident
                pl.BlockSpec((1, H), lambda i: (0, 0)),    # dense b: resident
                pl.BlockSpec((Lp, H), lambda i: (0, 0)),   # out_proj W: resident
                pl.BlockSpec((1, Lp), lambda i: (0, 0)),   # out_proj b: resident
            ],
            out_specs=pl.BlockSpec((tb, Lp), lambda i: (i, 0)),
        ),
        compiler_params=pltpu.CompilerParams(
            dimension_semantics=("parallel",),    # megacore sharding on v7x
            vmem_limit_bytes=vmem_limit,
        ),
        cost_estimate=cost,
    )(features, w1, b1, w2p, b2p)

    return out[:, :num_labels]


def _reference(features, w_dense, b_dense, w_out, b_out):
    h = jnp.tanh(features @ w_dense.T + b_dense)
    return h @ w_out.T + b_out


if __name__ == "__main__":
    # Small, module-consistent shapes: batch=2, hidden_size=32, num_labels=5.
    B, H, L = 2, 32, 5

    key = jax.random.PRNGKey(0)
    k_x, k_w1, k_b1, k_w2, k_b2 = jax.random.split(key, 5)

    features = jax.random.normal(k_x, (B, H), dtype=jnp.float32)
    # torch nn.Linear weight layout is [out_features, in_features]
    w_dense = jax.random.normal(k_w1, (H, H), dtype=jnp.float32) * 0.05
    b_dense = jax.random.normal(k_b1, (H,), dtype=jnp.float32) * 0.05
    w_out = jax.random.normal(k_w2, (L, H), dtype=jnp.float32) * 0.05
    b_out = jax.random.normal(k_b2, (L,), dtype=jnp.float32) * 0.05

    # One-time parameter prep (outside the hot path).
    w1, b1, w2p, b2p, n_labels = prepare_head_params(w_dense, b_dense,
                                                     w_out, b_out)

    out = wav2vec2_classification_head(features, w1, b1, w2p, b2p,
                                       num_labels=n_labels)
    out = jax.block_until_ready(out)

    ref = _reference(features, w_dense, b_dense, w_out, b_out)
    assert out.shape == (B, L), out.shape
    assert jnp.allclose(out, ref, atol=1e-5, rtol=1e-5), "mismatch vs reference"

    # Dropout layers are identity in eval/inference mode; training-mode dropout
    # would need pltpu.prng_random_bits masking.
    print("KERNEL_OK")
</pallas_src>

<mosaic_0001>
module attributes {stable_mosaic.version = 11 : i64} {
  func.func @_head_kernel(%arg0: i32, %arg1: memref<2x32xf32, #tpu.memory_space<vmem>>, %arg2: memref<32x32xf32, #tpu.memory_space<vmem>>, %arg3: memref<1x32xf32, #tpu.memory_space<vmem>>, %arg4: memref<128x32xf32, #tpu.memory_space<vmem>>, %arg5: memref<1x128xf32, #tpu.memory_space<vmem>>, %arg6: memref<2x128xf32, #tpu.memory_space<vmem>>) attributes {dimension_semantics = [#tpu.dimension_semantics<parallel>], iteration_bounds = array<i64: 1>, scalar_prefetch = 0 : i64, scratch_operands = 0 : i64, tpu.core_type = #tpu.core_type<tc>, window_params = [{transform_indices = @transform_0, window_bounds = array<i64: 2, 32>}, {pipeline_mode = #tpu.pipeline_mode<synchronous>, transform_indices = @transform_1, window_bounds = array<i64: 32, 32>}, {pipeline_mode = #tpu.pipeline_mode<synchronous>, transform_indices = @transform_2, window_bounds = array<i64: 1, 32>}, {pipeline_mode = #tpu.pipeline_mode<synchronous>, transform_indices = @transform_3, window_bounds = array<i64: 128, 32>}, {pipeline_mode = #tpu.pipeline_mode<synchronous>, transform_indices = @transform_4, window_bounds = array<i64: 1, 128>}, {transform_indices = @transform_5, window_bounds = array<i64: 2, 128>}]} {
    %c0 = arith.constant 0 : index
    %c0_0 = arith.constant 0 : index
    %0 = vector.load %arg1[%c0, %c0_0] : memref<2x32xf32, #tpu.memory_space<vmem>>, vector<2x32xf32>
    %c0_1 = arith.constant 0 : index
    %c0_2 = arith.constant 0 : index
    %1 = vector.load %arg2[%c0_1, %c0_2] : memref<32x32xf32, #tpu.memory_space<vmem>>, vector<32x32xf32>
    %cst = arith.constant dense<0.000000e+00> : vector<2x32xf32>
    %2 = tpu.matmul %0, %1, %cst {dimension_numbers = #tpu.dot_dimension_numbers<[1], [1], [0], [0], [0, 0, 1, 0], [], []>} : vector<2x32xf32>, vector<32x32xf32>, vector<2x32xf32> -> vector<2x32xf32>
    %c0_3 = arith.constant 0 : index
    %c0_4 = arith.constant 0 : index
    %3 = vector.load %arg3[%c0_3, %c0_4] : memref<1x32xf32, #tpu.memory_space<vmem>>, vector<1x32xf32>
    %4 = vector.broadcast %3 : vector<1x32xf32> to vector<2x32xf32>
    %5 = arith.addf %2, %4 : vector<2x32xf32>
    %6 = math.tanh %5 : vector<2x32xf32>
    %c0_5 = arith.constant 0 : index
    %c0_6 = arith.constant 0 : index
    %7 = vector.load %arg4[%c0_5, %c0_6] : memref<128x32xf32, #tpu.memory_space<vmem>>, vector<128x32xf32>
    %cst_7 = arith.constant dense<0.000000e+00> : vector<2x128xf32>
    %8 = tpu.matmul %6, %7, %cst_7 {dimension_numbers = #tpu.dot_dimension_numbers<[1], [1], [0], [0], [0, 0, 1, 0], [], []>} : vector<2x32xf32>, vector<128x32xf32>, vector<2x128xf32> -> vector<2x128xf32>
    %c0_8 = arith.constant 0 : index
    %c0_9 = arith.constant 0 : index
    %9 = vector.load %arg5[%c0_8, %c0_9] : memref<1x128xf32, #tpu.memory_space<vmem>>, vector<1x128xf32>
    %10 = vector.broadcast %9 : vector<1x128xf32> to vector<2x128xf32>
    %11 = arith.addf %8, %10 : vector<2x128xf32>
    %c0_10 = arith.constant 0 : index
    %c0_11 = arith.constant 0 : index
    %12 = vector.load %arg6[%c0_10, %c0_11] : memref<2x128xf32, #tpu.memory_space<vmem>>, vector<2x128xf32>
    tpu.vector_store %arg6[%c0_10, %c0_11], %11 {strides = array<i32>} : memref<2x128xf32, #tpu.memory_space<vmem>>, vector<2x128xf32>,
    return
  }
  func.func @transform_0(%arg0: i32) -> (i32, i32) {
    %c0_i32 = arith.constant 0 : i32
    %c0_i32_0 = arith.constant 0 : i32
    return %arg0, %c0_i32 : i32, i32
  }
  func.func @transform_1(%arg0: i32) -> (i32, i32) {
    %c0_i32 = arith.constant 0 : i32
    %c0_i32_0 = arith.constant 0 : i32
    %c0_i32_1 = arith.constant 0 : i32
    return %c0_i32, %c0_i32_0 : i32, i32
  }
  func.func @transform_2(%arg0: i32) -> (i32, i32) {
    %c0_i32 = arith.constant 0 : i32
    %c0_i32_0 = arith.constant 0 : i32
    %c0_i32_1 = arith.constant 0 : i32
    return %c0_i32, %c0_i32_0 : i32, i32
  }
  func.func @transform_3(%arg0: i32) -> (i32, i32) {
    %c0_i32 = arith.constant 0 : i32
    %c0_i32_0 = arith.constant 0 : i32
    %c0_i32_1 = arith.constant 0 : i32
    return %c0_i32, %c0_i32_0 : i32, i32
  }
  func.func @transform_4(%arg0: i32) -> (i32, i32) {
    %c0_i32 = arith.constant 0 : i32
    %c0_i32_0 = arith.constant 0 : i32
    %c0_i32_1 = arith.constant 0 : i32
    return %c0_i32, %c0_i32_0 : i32, i32
  }
  func.func @transform_5(%arg0: i32) -> (i32, i32) {
    %c0_i32 = arith.constant 0 : i32
    %c0_i32_0 = arith.constant 0 : i32
    return %arg0, %c0_i32 : i32, i32
  }
}

</mosaic_0001>

<bundles_post_ra>
// kernel: wav2vec2_classification_head.1
= control target key start
LH: loop header
LB: loop body
LE: loop exit
PB: predicated region body
PF: predicated region fallthrough
CT: control target
= control target key end

     0   :  { %vm33_vm0 = vcmask 261120   ;;  %v441_v2 = vmov 0.0|0.0   ;;  %vm442_vm2 = vmmov 0   ;;  %v443_v5 = vmov 0.0   ;;  %s584_s0 = inlined_call_operand.vmem [shape: f32[2,32], index: 0, kind: input, shape index: {}]   ;;  %s585_s1 = inlined_call_operand.vmem [shape: f32[32,32], index: 1, kind: input, shape index: {}]   ;;  %s586_s2 = inlined_call_operand.vmem [shape: f32[1,32], index: 2, kind: input, shape index: {}]   ;;  %s587_s3 = inlined_call_operand.vmem [shape: f32[128,32], index: 3, kind: input, shape index: {}]   ;;  %s588_s4 = inlined_call_operand.vmem [shape: f32[1,128], index: 4, kind: input, shape index: {}]   ;;  %s589_s5 = inlined_call_operand.hbm [shape: f32[2,128], index: 5, kind: output, shape index: {}]  }
   0x1   :  { %v22_v0 = vld [vmem:[%s585_s1] sm:$0xff]  ;;  %v23_v1 = vld [vmem:[%s585_s1 + $0x8] sm:$0xff]  ;;  %371 = vmatprep.subr.bf16.mxu0 %v441_v2  ;;  %vm483_vm1 = vmpackc.low %vm33_vm0, %vm33_vm0  ;;  %379 = vmatprep.subr.bf16.mxu1 %v441_v2 }
   0x2   :  { %v372_v3 = vpack.c.bf16 %v23_v1, %v22_v0  ;;  %333 = vmatprep.mubr.msk.f32.mxu0 %vm442_vm2, %v443_v5  ;;  %v120_v6 = vld [vmem:[%s587_s3] sm:$0xff]  ;;  %v121_v7 = vld [vmem:[%s587_s3 + $0x8] sm:$0xff]  ;;  %368 = vmatprep.mubr.msk.f32.mxu1 %vm442_vm2, %v443_v5  ;;  %v24_v9 = vld [vmem:[%s585_s1 + $0x10] sm:$0xff] }
   0x3   :  { %v380_v8 = vpack.c.bf16 %v121_v7, %v120_v6  ;;  %v25_v10 = vld [vmem:[%s585_s1 + $0x18] sm:$0xff]  ;;  %v122_v11 = vld [vmem:[%s587_s3 + $0x10] sm:$0xff] }
   0x4   :  { %374 = vmatpush3.bf16.xpose.msk.msra.mxu0 %vm483_vm1, %v372_v3  ;;  %v123_v12 = vld [vmem:[%s587_s3 + $0x18] sm:$0xff]  ;;  %v376_v13 = vpack.c.bf16 %v25_v10, %v24_v9 }
   0x5   :  { %375 = vmatprep.subr.bf16.mxu0 %v441_v2  ;;  %382 = vmatpush3.bf16.xpose.msk.msra.mxu1 %vm483_vm1, %v380_v8 }
   0x6   :  { %383 = vmatprep.subr.bf16.mxu1 %v441_v2 }
   0x7   :  { %10 = vsyncpa [#allocation3], 0  ;;  %v384_v14 = vpack.c.bf16 %v123_v12, %v122_v11  ;;  %v124_v15 = vld [vmem:[%s587_s3 + $0x20] sm:$0xff]  ;;  %v125_v16 = vld [vmem:[%s587_s3 + $0x28] sm:$0xff] }
   0x8   :  { %v21_v17 = vld [vmem:[%s584_s0] sm:$0x3]  ;;  %v388_v18 = vpack.c.bf16 %v125_v16, %v124_v15  ;;  %v126_v19 = vld [vmem:[%s587_s3 + $0x30] sm:$0xff]  ;;  %v127_v20 = vld [vmem:[%s587_s3 + $0x38] sm:$0xff] }
   0x9   :  { %v392_v21 = vpack.c.bf16 %v127_v20, %v126_v19  ;;  %v128_v22 = vld [vmem:[%s587_s3 + $0x40] sm:$0xff]  ;;  %v129_v23 = vld [vmem:[%s587_s3 + $0x48] sm:$0xff]  ;;  %v130_v25 = vld [vmem:[%s587_s3 + $0x50] sm:$0xff] }
   0xa   :  { %v396_v24 = vpack.c.bf16 %v129_v23, %v128_v22  ;;  %v131_v26 = vld [vmem:[%s587_s3 + $0x58] sm:$0xff]  ;;  %v132_v28 = vld [vmem:[%s587_s3 + $0x60] sm:$0xff]  ;;  %v133_v29 = vld [vmem:[%s587_s3 + $0x68] sm:$0xff] }
   0xb   :  { %v400_v27 = vpack.c.bf16 %v131_v26, %v130_v25  ;;  %v404_v30 = vpack.c.bf16 %v133_v29, %v132_v28  ;;  %v134_v31 = vld [vmem:[%s587_s3 + $0x70] sm:$0xff]  ;;  %v135_v32 = vld [vmem:[%s587_s3 + $0x78] sm:$0xff]  ;;  %v279_v34 = vld [vmem:[%s586_s2] ss:$0 sm:$0xff]  ;;  %s444_s3 = smov [#allocation2]  }
   0xc   :  { %378 = vmatpush3.bf16.xpose.msk.msra.mxu0 %vm483_vm1, %v376_v13  ;;  %v408_v33 = vpack.c.bf16 %v135_v32, %v134_v31  ;;  %v285_v39 = vld [vmem:[%s588_s4] ss:$0 sm:$0xff]  ;;  %s271_s11 = sshll.u32 %s444_s3, 4  ;;  %s272_s11 = int_to_ptr.vmem [resolvable:$true] %s271_s11 }
   0xd   :  { %386 = vmatpush3.bf16.xpose.msk.msra.mxu1 %vm483_vm1, %v384_v14  ;;  %s417_s12 = scalar_lea.vmem %s272_s11, 32  ;;  %p422_p1 = scmp.lt.s32.totalorder %s272_s11, %s272_s11 }
   0xe   :  { %387 = vmatprep.subr.bf16.mxu1 %v441_v2  ;;  %p418_p0 = scmp.ne.s32.totalorder %s272_s11, %s417_s12  ;;  %p423_p2 = scmp.lt.s32.totalorder %s417_s12, %s417_s12 }
  0x10   :  { %p424_p3 = por %p423_p2, %p422_p1 }
  0x12   :  { %p425_p4 = pnand %p424_p3, %p418_p0 }
  0x13   :  { %334 = vmatmul.mubr.msk.f32.vlgmr.msra.gmra.mrb[0].mxu0 %vm33_vm0, %v21_v17 }
  0x15   :  { %390 = vmatpush3.bf16.xpose.msk.msra.mxu1 %vm483_vm1, %v388_v18 }
  0x16   :  { %391 = vmatprep.subr.bf16.mxu1 %v441_v2 }
  0x1d   :  { %394 = vmatpush3.bf16.xpose.msk.msra.mxu1 %vm483_vm1, %v392_v21 }
  0x1e   :  { %395 = vmatprep.subr.bf16.mxu1 %v441_v2 }
  0x25   :  { %398 = vmatpush3.bf16.xpose.msk.msra.mxu1 %vm483_vm1, %v396_v24 }
  0x26   :  { %399 = vmatprep.subr.bf16.mxu1 %v441_v2 }
  0x2d   :  { %402 = vmatpush3.bf16.xpose.msk.msra.mxu1 %vm483_vm1, %v400_v27 }
  0x2e   :  { %403 = vmatprep.subr.bf16.mxu1 %v441_v2 }
  0x35   :  { %406 = vmatpush3.bf16.xpose.msk.msra.mxu1 %vm483_vm1, %v404_v30 }
  0x36   :  { %407 = vmatprep.subr.bf16.mxu1 %v441_v2 }
  0x3d   :  { %410 = vmatpush3.bf16.xpose.msk.msra.mxu1 %vm483_vm1, %v408_v33 }
  0xe6   :  { %v115_v35 = vpop.f32.mrb[0].mxu0 }
  0xe7   :  { %v116_v36 = vadd.f32 %v279_v34, %v115_v35  ;;  %v335_v37 = vpop.f32.mrb[1].mxu0 }
  0xe9   :  { %415 = vtanh.f32 %v116_v36 }
  0xf3   :  { %v416_v38 = vpop.eup %415 }
  0xf4   :  { %369 = vmatmul.mubr.msk.f32.vlgmr.msra.gmra.mrb[0].mxu1 %vm33_vm0, %v416_v38 }
 0x1c7   :  { %v260_v40 = vpop.f32.mrb[0].mxu1 }
 0x1c8   :  { %v261_v41 = vadd.f32 %v285_v39, %v260_v40  ;;  %v370_v42 = vpop.f32.mrb[1].mxu1 }
 0x1ca   :  { %264 = vst [vmem:[#allocation2] sm:$0x3] %v261_v41 }
 0x1cb   :  { %428 = shalt.err (!%p425_p4)
}
 0x1cc   :  { %s429_s14 = scalar_lea.hbm %s589_s5, 32 }
 0x1cd   :  { %p430_p5 = scmp.ne.s32.totalorder %s589_s5, %s429_s14  ;;  %p433_p6 = scmp.lt.u32.totalorder %s429_s14, %s589_s5 }
 0x1cf   :  { %p435_p7 = pnand %p433_p6, %p430_p5 }
 0x1d1   :  { %438 = shalt.err (!%p435_p7)
}
 0x1d2   :  { %274 = dma.vmem_to_hbm [thread:$0]  %s272_s11, 32, %s589_s5, [#allocation3]  }
 0x1d3   :  { %439 = dma.done.wait [#allocation3], 32  }
 0x1d4   :  { %440 = vsyncadd [#allocation3], 4294967264 }
 0x1d5   :  { %278 = vsyncpa [#allocation3], 1 }

</bundles_post_ra>
